<compile_context>
chip_gen: v5e
topology: v5e:2x2
jax: 0.10.0
libtpu: 0.0.40
codegen_flags: <defaults>
</compile_context>

<pallas_src>
import numpy as np
import jax
import jax.numpy as jnp
from jax.experimental import pallas as pl
from jax.experimental.pallas import tpu as pltpu

IN_CH = 3
ENC_DIM = 32
OUT_CH = 64
VOXEL = 0.25
K_NN = 3
BN_EPS = 1e-5

TQ = 512            # row tile (points / voxels) for all row-tiled kernels
TV = 512            # voxel chunk processed per in-kernel step (multiple of 128)
VOX_BUCKET = 512    # per-element voxel padding (multiple of TQ and TV)
SENTINEL = 1e30     # ||dst||^2 of padded voxel columns -> effectively never selected

_PAR_1D = pltpu.CompilerParams(dimension_semantics=("parallel",))


def _bucket(n, m):
    return max(m, ((n + m - 1) // m) * m)


# ----------------------------------------------------------------------------- kernels
def enc_mlp_kernel(x_ref, w1_ref, b1_ref, w2_ref, b2_ref, o_ref):
    """Fused 2-layer MLP; eval-mode BatchNorm scale folded into the weights."""
    x = x_ref[...]
    h = jnp.tanh(jnp.dot(x, w1_ref[...], preferred_element_type=jnp.float32) + b1_ref[...])
    o_ref[...] = jnp.tanh(jnp.dot(h, w2_ref[...], preferred_element_type=jnp.float32)
                          + b2_ref[...])


def head_kernel(x_ref, w_ref, b_ref, o_ref):
    """Final 1x1-conv-equivalent linear + bias, fused per-row L2 normalization (EUP rsqrt)."""
    y = jnp.dot(x_ref[...], w_ref[...], preferred_element_type=jnp.float32) + b_ref[...]
    inv = jax.lax.rsqrt(jnp.sum(y * y, axis=-1, keepdims=True) + 1e-24)
    o_ref[...] = y * inv


def make_fused_upsample_kernel(k, mv, tv, idx_bits):
    """Fused: pairwise sq-distance -> streaming top-k (packed float keys) -> IDW scatter-matmul.

    Per grid step the kernel sees one (TQ, 3) tile of query points plus the batch element's
    fully VMEM-resident voxel tables: dstT (3, mv), dd (1, mv) and voxfeat (mv, 64)."""
    assert mv % tv == 0 and k >= 1
    nchunks = mv // tv
    low = (1 << idx_bits) - 1
    LOW = np.int32(low)          # mask for the global voxel index (low mantissa bits)
    HIGH = np.int32(~low)        # mask for the (quantized) distance bits
    INF = np.float32(np.inf)

    def smallest_k(keys, kk):
        """kk smallest (as a list of (rows, 1) columns); one lane-min + one select per pick."""
        picks = []
        work = keys
        for j in range(kk):
            m = jnp.min(work, axis=-1, keepdims=True)
            picks.append(m)
            if j + 1 < kk:
                work = jnp.where(work == m, INF, work)
        return picks

    def kernel(src_ref, dd_ref, dstT_ref, vf_ref, o_ref):
        src = src_ref[0]                                               # (TQ, 3)
        tq = src.shape[0]
        ss = src[:, 0:1] ** 2 + src[:, 1:2] ** 2 + src[:, 2:3] ** 2    # (TQ, 1)

        # ---- pass 1: streaming top-k over resident voxel chunks (carried in vregs) ----
        run = None
        for c in range(nchunks):                                       # static unroll
            lo = c * tv
            ddv = dd_ref[0, :, lo:lo + tv]                             # (1, tv)
            d = ss + ddv                                               # (TQ, tv)
            for a in range(3):                                         # VPU outer-product FMAs
                dta = dstT_ref[0, a:a + 1, lo:lo + tv]                 # (1, tv)
                d = d - (2.0 * src[:, a:a + 1]) * dta
            # clamp so packed keys stay positive *normal* finite floats
            d = jnp.clip(d, 1e-12, 1e37)
            col = jax.lax.broadcasted_iota(jnp.int32, (1, tv), 1) + lo
            keys = pltpu.bitcast((pltpu.bitcast(d, jnp.int32) & HIGH) | col, jnp.float32)
            local = smallest_k(keys, k)                                # k x (TQ, 1)
            if run is None:
                run = jnp.concatenate(local, axis=-1)                  # (TQ, k)
            else:
                cand = jnp.concatenate([run] + local, axis=-1)         # (TQ, 2k)
                run = jnp.concatenate(smallest_k(cand, k), axis=-1)

        # ---- unpack indices + quantized squared distances, IDW weights ----
        ib = pltpu.bitcast(run, jnp.int32)                             # (TQ, k)
        idxs = ib & LOW
        dq = pltpu.bitcast(ib & HIGH, jnp.float32)
        w = 1.0 / (jnp.sqrt(dq) + 1e-7)
        w = w / jnp.sum(w, axis=-1, keepdims=True)                     # (TQ, k)

        # ---- pass 2: IDW interpolation as one-hot scatter-matmul over resident features ----
        acc = jnp.zeros((tq, OUT_CH), jnp.float32)
        for c in range(nchunks):                                       # static unroll
            lo = c * tv
            col = jax.lax.broadcasted_iota(jnp.int32, (1, tv), 1) + lo
            wmat = jnp.where(col == idxs[:, 0:1], w[:, 0:1], 0.0)      # (TQ, tv)
            for j in range(1, k):
                wmat = wmat + jnp.where(col == idxs[:, j:j + 1], w[:, j:j + 1], 0.0)
            vfv = vf_ref[0, lo:lo + tv, :]                             # (tv, 64)
            acc = acc + jnp.dot(wmat, vfv, preferred_element_type=jnp.float32)
        o_ref[0] = acc

    return kernel


# ----------------------------------------------------------------------------- wrappers
def run_enc_mlp(x, p):
    n = x.shape[0]
    return pl.pallas_call(
        enc_mlp_kernel,
        out_shape=jax.ShapeDtypeStruct((n, ENC_DIM), jnp.float32),
        grid=(n // TQ,),
        in_specs=[
            pl.BlockSpec((TQ, IN_CH), lambda i: (i, 0)),
            pl.BlockSpec((IN_CH, ENC_DIM), lambda i: (0, 0)),
            pl.BlockSpec((1, ENC_DIM), lambda i: (0, 0)),
            pl.BlockSpec((ENC_DIM, ENC_DIM), lambda i: (0, 0)),
            pl.BlockSpec((1, ENC_DIM), lambda i: (0, 0)),
        ],
        out_specs=pl.BlockSpec((TQ, ENC_DIM), lambda i: (i, 0)),
        compiler_params=_PAR_1D,
    )(x, p["w1"], p["b1"], p["w2"], p["b2"])


def run_head(x, p):
    n, cin = x.shape
    return pl.pallas_call(
        head_kernel,
        out_shape=jax.ShapeDtypeStruct((n, OUT_CH), jnp.float32),
        grid=(n // TQ,),
        in_specs=[
            pl.BlockSpec((TQ, cin), lambda i: (i, 0)),
            pl.BlockSpec((cin, OUT_CH), lambda i: (0, 0)),
            pl.BlockSpec((1, OUT_CH), lambda i: (0, 0)),
        ],
        out_specs=pl.BlockSpec((TQ, OUT_CH), lambda i: (i, 0)),
        compiler_params=_PAR_1D,
    )(x, p["wf"], p["bf"])


def run_fused_upsample(src, dd, dstT, vf, k):
    """src: (B, NP, 3); dd: (B, 1, Mv); dstT: (B, 3, Mv); vf: (B, Mv, 64) -> (B, NP, 64)."""
    bt, n_pad, _ = src.shape
    mv = vf.shape[1]
    assert n_pad % TQ == 0 and mv % TV == 0
    idx_bits = max(1, int(np.ceil(np.log2(mv))))

    # explicit VMEM budget: resident tables (double-buffered by the pipeline) + working tiles.
    resident = 2 * (3 * mv + mv + mv * OUT_CH) * 4
    working = 10 * TQ * TV * 4
    vmem_bytes = int(max(32 * 1024 * 1024, min(resident + working + (4 << 20), 100 * 1024 * 1024)))

    return pl.pallas_call(
        make_fused_upsample_kernel(k, mv, TV, idx_bits),
        out_shape=jax.ShapeDtypeStruct((bt, n_pad, OUT_CH), jnp.float32),
        grid=(bt, n_pad // TQ),
        in_specs=[
            pl.BlockSpec((1, TQ, 3), lambda b, i: (b, i, 0)),
            pl.BlockSpec((1, 1, mv), lambda b, i: (b, 0, 0)),      # VMEM-resident per element
            pl.BlockSpec((1, 3, mv), lambda b, i: (b, 0, 0)),      # VMEM-resident per element
            pl.BlockSpec((1, mv, OUT_CH), lambda b, i: (b, 0, 0)),  # VMEM-resident per element
        ],
        out_specs=pl.BlockSpec((1, TQ, OUT_CH), lambda b, i: (b, i, 0)),
        compiler_params=pltpu.CompilerParams(
            dimension_semantics=("parallel", "parallel"),
            vmem_limit_bytes=vmem_bytes),
    )(src, dd, dstT, vf)


# ----------------------------------------------------------------------------- params
def make_params(key):
    ks = jax.random.split(key, 4)
    w1 = jax.random.normal(ks[0], (IN_CH, ENC_DIM), jnp.float32) * 0.1
    w2 = jax.random.normal(ks[1], (ENC_DIM, ENC_DIM), jnp.float32) * 0.1
    # eval-mode BatchNorm1d (gamma=1, beta=0, mean=0, var=1): scale folded into weights.
    g = np.float32(1.0 / np.sqrt(1.0 + BN_EPS))
    b = jnp.zeros((1, ENC_DIM), jnp.float32)
    wf = jax.random.normal(ks[2], (IN_CH + ENC_DIM, OUT_CH), jnp.float32) * 0.1
    bf = jax.random.normal(ks[3], (1, OUT_CH), jnp.float32) * 0.1
    return dict(w1=w1 * g, b1=b, w2=w2 * g, b2=b, wf=wf, bf=bf)


# ----------------------------------------------------------------------------- model
def extractor_forward(xyz_1, feats_1, xyz_2, feats_2, params, k_values=K_NN):
    """Equivalent of FastPointTransformerFeatureExtractor.forward.
    xyz_*: (B, N, 3) world-space points; feats_*: (B, N, 3) per-point input features
    (stand-ins for the ME.TensorField inputs st_1 / st_2). Returns (B, N, 64) each."""
    clouds = [(np.asarray(xyz_1, np.float32), np.asarray(feats_1, np.float32)),
              (np.asarray(xyz_2, np.float32), np.asarray(feats_2, np.float32))]

    # ---- phase A: host voxelization (coordinate-manager equivalent), per batch element ----
    elems = []
    for xyz, feats in clouds:
        for b in range(xyz.shape[0]):
            pts_vox = (xyz[b] / VOXEL).astype(np.float32)             # TensorField coords
            vcoord = np.floor(pts_vox).astype(np.int64)
            uniq, inv = np.unique(vcoord, axis=0, return_inverse=True)
            elems.append(dict(
                pts=pts_vox,
                feats=feats[b],
                uniq=uniq.astype(np.float32),
                inv=inv.reshape(-1).astype(np.int32),
                nv=int(uniq.shape[0]),
                mv=_bucket(int(uniq.shape[0]), VOX_BUCKET)))
    off = 0
    for e in elems:
        e["off"] = off
        off += e["mv"]
    mtot = off                                                        # multiple of TQ

    # ---- phase B: batched voxel stats + enc_mlp + head (single Pallas calls, all elements) ----
    all_pts = jnp.asarray(np.concatenate([e["pts"] for e in elems], axis=0))
    all_feats = jnp.asarray(np.concatenate([e["feats"] for e in elems], axis=0))
    all_inv = jnp.asarray(np.concatenate([e["inv"] + e["off"] for e in elems], axis=0))
    ptot = int(all_pts.shape[0])

    ones = jnp.ones((ptot, 1), jnp.float32)
    counts = jnp.maximum(jax.ops.segment_sum(ones, all_inv, num_segments=mtot), 1.0)
    vfeat = jax.ops.segment_sum(all_feats, all_inv, num_segments=mtot) / counts  # UNWEIGHTED_AVERAGE
    cent = jax.ops.segment_sum(all_pts, all_inv, num_segments=mtot) / counts     # downsample_points
    norm_points = all_pts - cent[all_inv]                                         # normalize_points

    ptot_p = _bucket(ptot, TQ)
    pos_emb = run_enc_mlp(jnp.pad(norm_points, ((0, ptot_p - ptot), (0, 0))), params)[:ptot]
    down_emb = jax.ops.segment_sum(pos_emb, all_inv, num_segments=mtot) / counts  # downsample_embeddings
    feat_cat = jnp.concatenate([vfeat, down_emb], axis=1)                         # (mtot, 35)

    # TODO(synk): MinkowskiEngine sparse self-attention backbone not translated (see header).
    voxfeat = run_head(feat_cat, params)                                          # (mtot, 64), L2-normed

    # ---- phase C: per-cloud batched fused kNN + IDW upsample ----
    outs = []
    ei = 0
    for xyz, _ in clouds:
        b_sz, n, _ = xyz.shape
        es = elems[ei:ei + b_sz]
        ei += b_sz
        mv_max = max(e["mv"] for e in es)
        n_pad = _bucket(n, TQ)
        src = jnp.asarray(np.pad(xyz, ((0, 0), (0, n_pad - n), (0, 0))))
        dstT = np.zeros((b_sz, 3, mv_max), np.float32)
        dd = np.full((b_sz, 1, mv_max), SENTINEL, np.float32)
        vf_slabs = []
        for bi, e in enumerate(es):
            sparse_xyz = e["uniq"] * VOXEL                            # coordinates_at(b) * voxel_size
            dstT[bi, :, :e["nv"]] = sparse_xyz.T
            dd[bi, 0, :e["nv"]] = (sparse_xyz * sparse_xyz).sum(-1)
            slab = voxfeat[e["off"]:e["off"] + e["mv"]]
            vf_slabs.append(jnp.pad(slab, ((0, mv_max - e["mv"]), (0, 0))))
        vf = jnp.stack(vf_slabs, axis=0)                              # (B, mv_max, 64)
        up = run_fused_upsample(src, jnp.asarray(dd), jnp.asarray(dstT), vf, k_values)
        outs.append(up[:, :n, :])
    return outs[0], outs[1]


# ----------------------------------------------------------------------------- main
if __name__ == "__main__":
    key = jax.random.PRNGKey(0)
    B, N = 2, 64
    k1, k2, k3, k4, k5 = jax.random.split(key, 5)

    xyz_1 = np.asarray(jax.random.uniform(k1, (B, N, 3), jnp.float32, 0.0, 2.0))
    xyz_2 = np.asarray(jax.random.uniform(k2, (B, N, 3), jnp.float32, 0.0, 2.0))
    st_feats_1 = np.asarray(jax.random.normal(k3, (B, N, 3), jnp.float32))
    st_feats_2 = np.asarray(jax.random.normal(k4, (B, N, 3), jnp.float32))

    params = make_params(k5)

    f_1, f_2 = extractor_forward(xyz_1, st_feats_1, xyz_2, st_feats_2, params, k_values=K_NN)
    jax.block_until_ready((f_1, f_2))
    assert f_1.shape == (B, N, OUT_CH) and f_2.shape == (B, N, OUT_CH)
    assert bool(jnp.all(jnp.isfinite(f_1))) and bool(jnp.all(jnp.isfinite(f_2)))
    print("KERNEL_OK")
</pallas_src>

<mosaic_0001>
module attributes {stable_mosaic.version = 11 : i64} {
  func.func @enc_mlp_kernel(%arg0: i32, %arg1: memref<512x3xf32, #tpu.memory_space<vmem>>, %arg2: memref<3x32xf32, #tpu.memory_space<vmem>>, %arg3: memref<1x32xf32, #tpu.memory_space<vmem>>, %arg4: memref<32x32xf32, #tpu.memory_space<vmem>>, %arg5: memref<1x32xf32, #tpu.memory_space<vmem>>, %arg6: memref<512x32xf32, #tpu.memory_space<vmem>>) attributes {dimension_semantics = [#tpu.dimension_semantics<parallel>], iteration_bounds = array<i64: 1>, scalar_prefetch = 0 : i64, scratch_operands = 0 : i64, tpu.core_type = #tpu.core_type<tc>, window_params = [{transform_indices = @transform_0, window_bounds = array<i64: 512, 3>}, {pipeline_mode = #tpu.pipeline_mode<synchronous>, transform_indices = @transform_1, window_bounds = array<i64: 3, 32>}, {pipeline_mode = #tpu.pipeline_mode<synchronous>, transform_indices = @transform_2, window_bounds = array<i64: 1, 32>}, {pipeline_mode = #tpu.pipeline_mode<synchronous>, transform_indices = @transform_3, window_bounds = array<i64: 32, 32>}, {pipeline_mode = #tpu.pipeline_mode<synchronous>, transform_indices = @transform_4, window_bounds = array<i64: 1, 32>}, {transform_indices = @transform_5, window_bounds = array<i64: 512, 32>}]} {
    %c0 = arith.constant 0 : index
    %c0_0 = arith.constant 0 : index
    %0 = vector.load %arg1[%c0, %c0_0] : memref<512x3xf32, #tpu.memory_space<vmem>>, vector<512x3xf32>
    %c0_1 = arith.constant 0 : index
    %c0_2 = arith.constant 0 : index
    %1 = vector.load %arg2[%c0_1, %c0_2] : memref<3x32xf32, #tpu.memory_space<vmem>>, vector<3x32xf32>
    %cst = arith.constant dense<0.000000e+00> : vector<512x32xf32>
    %2 = tpu.matmul %0, %1, %cst {dimension_numbers = #tpu.dot_dimension_numbers<[1], [0], [0], [1], [0, 0, 1, 1], [], []>} : vector<512x3xf32>, vector<3x32xf32>, vector<512x32xf32> -> vector<512x32xf32>
    %c0_3 = arith.constant 0 : index
    %c0_4 = arith.constant 0 : index
    %3 = vector.load %arg3[%c0_3, %c0_4] : memref<1x32xf32, #tpu.memory_space<vmem>>, vector<1x32xf32>
    %4 = vector.broadcast %3 : vector<1x32xf32> to vector<512x32xf32>
    %5 = arith.addf %2, %4 : vector<512x32xf32>
    %6 = math.tanh %5 : vector<512x32xf32>
    %c0_5 = arith.constant 0 : index
    %c0_6 = arith.constant 0 : index
    %7 = vector.load %arg4[%c0_5, %c0_6] : memref<32x32xf32, #tpu.memory_space<vmem>>, vector<32x32xf32>
    %cst_7 = arith.constant dense<0.000000e+00> : vector<512x32xf32>
    %8 = tpu.matmul %6, %7, %cst_7 {dimension_numbers = #tpu.dot_dimension_numbers<[1], [0], [0], [1], [0, 0, 1, 1], [], []>} : vector<512x32xf32>, vector<32x32xf32>, vector<512x32xf32> -> vector<512x32xf32>
    %c0_8 = arith.constant 0 : index
    %c0_9 = arith.constant 0 : index
    %9 = vector.load %arg5[%c0_8, %c0_9] : memref<1x32xf32, #tpu.memory_space<vmem>>, vector<1x32xf32>
    %10 = vector.broadcast %9 : vector<1x32xf32> to vector<512x32xf32>
    %11 = arith.addf %8, %10 : vector<512x32xf32>
    %12 = math.tanh %11 : vector<512x32xf32>
    %c0_10 = arith.constant 0 : index
    %c0_11 = arith.constant 0 : index
    %13 = vector.load %arg6[%c0_10, %c0_11] : memref<512x32xf32, #tpu.memory_space<vmem>>, vector<512x32xf32>
    tpu.vector_store %arg6[%c0_10, %c0_11], %12 {strides = array<i32>} : memref<512x32xf32, #tpu.memory_space<vmem>>, vector<512x32xf32>,
    return
  }
  func.func @transform_0(%arg0: i32) -> (i32, i32) {
    %c0_i32 = arith.constant 0 : i32
    %c0_i32_0 = arith.constant 0 : i32
    return %arg0, %c0_i32 : i32, i32
  }
  func.func @transform_1(%arg0: i32) -> (i32, i32) {
    %c0_i32 = arith.constant 0 : i32
    %c0_i32_0 = arith.constant 0 : i32
    %c0_i32_1 = arith.constant 0 : i32
    return %c0_i32, %c0_i32_0 : i32, i32
  }
  func.func @transform_2(%arg0: i32) -> (i32, i32) {
    %c0_i32 = arith.constant 0 : i32
    %c0_i32_0 = arith.constant 0 : i32
    %c0_i32_1 = arith.constant 0 : i32
    return %c0_i32, %c0_i32_0 : i32, i32
  }
  func.func @transform_3(%arg0: i32) -> (i32, i32) {
    %c0_i32 = arith.constant 0 : i32
    %c0_i32_0 = arith.constant 0 : i32
    %c0_i32_1 = arith.constant 0 : i32
    return %c0_i32, %c0_i32_0 : i32, i32
  }
  func.func @transform_4(%arg0: i32) -> (i32, i32) {
    %c0_i32 = arith.constant 0 : i32
    %c0_i32_0 = arith.constant 0 : i32
    %c0_i32_1 = arith.constant 0 : i32
    return %c0_i32, %c0_i32_0 : i32, i32
  }
  func.func @transform_5(%arg0: i32) -> (i32, i32) {
    %c0_i32 = arith.constant 0 : i32
    %c0_i32_0 = arith.constant 0 : i32
    return %arg0, %c0_i32 : i32, i32
  }
}

</mosaic_0001>

<bundles_post_ra>
// kernel: tpu_custom_call.1
= control target key start
LH: loop header
LB: loop body
LE: loop exit
PB: predicated region body
PF: predicated region fallthrough
CT: control target
= control target key end

     0   :  { %vm282_vm0 = vcmask 1042432   ;;  %vm89_vm1 = vcmask 23552   ;;  %vm567_vm2 = vcmask 261120   ;;  %s2264_s1 = inlined_call_operand.vmem [shape: f32[3,32], index: 1, kind: input, shape index: {}]   ;;  %s2265_s0 = inlined_call_operand.vmem [shape: f32[512,3], index: 0, kind: input, shape index: {}]   ;;  %s2266_s2 = inlined_call_operand.vmem [shape: f32[1,32], index: 2, kind: input, shape index: {}]   ;;  %s2267_s3 = inlined_call_operand.vmem [shape: f32[32,32], index: 3, kind: input, shape index: {}]   ;;  %s2268_s4 = inlined_call_operand.vmem [shape: f32[1,32], index: 4, kind: input, shape index: {}]   ;;  %s2269_s5 = inlined_call_operand.vmem [shape: f32[512,32], index: 5, kind: output, shape index: {}]  }
   0x1   :  { %v84_v0 = vld [vmem:[%s2264_s1] sm:$0x7]  ;;  %v21_v2 = vld [vmem:[%s2265_s0 + $0x8] sm:$0xff]  ;;  %v22_v3 = vld [vmem:[%s2265_s0 + $0x10] sm:$0xff] }
   0x2   :  { %v20_v1 = vld [vmem:[%s2265_s0] sm:$0xff]  ;;  %1101 = vmatpush.msk.msra.mxu0 %vm282_vm0, %v84_v0  ;;  %1230 = vmatpush.msk.msra.mxu3 %vm282_vm0, %v84_v0  ;;  %v23_v4 = vld [vmem:[%s2265_s0 + $0x18] sm:$0xff]  ;;  %v25_v6 = vld [vmem:[%s2265_s0 + $0x28] sm:$0xff] }
   0x3   :  { %1102 = vmatmul.msk.f32.vlgmr.msra.gmra.mxu0 %vm89_vm1, %v20_v1  ;;  %v24_v5 = vld [vmem:[%s2265_s0 + $0x20] sm:$0xff]  ;;  %v26_v7 = vld [vmem:[%s2265_s0 + $0x30] sm:$0xff]  ;;  %v27_v8 = vld [vmem:[%s2265_s0 + $0x38] sm:$0xff] }
   0x4   :  { %v28_v9 = vld [vmem:[%s2265_s0 + $0x40] sm:$0xff]  ;;  %v29_v10 = vld [vmem:[%s2265_s0 + $0x48] sm:$0xff]  ;;  %v30_v11 = vld [vmem:[%s2265_s0 + $0x50] sm:$0xff] }
   0x5   :  { %v31_v12 = vld [vmem:[%s2265_s0 + $0x58] sm:$0xff]  ;;  %v32_v13 = vld [vmem:[%s2265_s0 + $0x60] sm:$0xff]  ;;  %v561_v15 = vld [vmem:[%s2267_s3 + $0x10] sm:$0xff] }
   0x6   :  { %v562_v14 = vld [vmem:[%s2267_s3 + $0x18] sm:$0xff]  ;;  %v560_v16 = vld [vmem:[%s2267_s3 + $0x8] sm:$0xff]  ;;  %v559_v18 = vld [vmem:[%s2267_s3] sm:$0xff] }
   0x7   :  { %772 = vmatpush.msra.mxu1 %v562_v14  ;;  %1231 = vmatpush.msra.mxu2 %v562_v14  ;;  %v33_v17 = vld [vmem:[%s2265_s0 + $0x68] sm:$0xff]  ;;  %v34_v19 = vld [vmem:[%s2265_s0 + $0x70] sm:$0xff]  ;;  %v35_v20 = vld [vmem:[%s2265_s0 + $0x78] sm:$0xff] }
   0x8   :  { %v1607_v21 = vld [vmem:[%s2266_s2] ss:$0 sm:$0xff]  ;;  %v37_v26 = vld [vmem:[%s2265_s0 + $0x88] sm:$0xff]  ;;  %v38_v30 = vld [vmem:[%s2265_s0 + $0x90] sm:$0xff] }
   0x9   :  { %773 = vmatpush.msra.mxu1 %v561_v15  ;;  %1232 = vmatpush.msra.mxu2 %v561_v15  ;;  %v36_v23 = vld [vmem:[%s2265_s0 + $0x80] sm:$0xff]  ;;  %v39_v34 = vld [vmem:[%s2265_s0 + $0x98] sm:$0xff]  ;;  %v41_v42 = vld [vmem:[%s2265_s0 + $0xa8] sm:$0xff] }
   0xa   :  { %v40_v38 = vld [vmem:[%s2265_s0 + $0xa0] sm:$0xff]  ;;  %v42_v46 = vld [vmem:[%s2265_s0 + $0xb0] sm:$0xff]  ;;  %v43_v50 = vld [vmem:[%s2265_s0 + $0xb8] sm:$0xff] }
   0xb   :  { %1103 = vmatmul.msk.f32.gmra.mxu0 %vm89_vm1, %v21_v2  ;;  %774 = vmatpush.msra.mxu1 %v560_v16  ;;  %v44_v54 = vld [vmem:[%s2265_s0 + $0xc0] sm:$0xff]  ;;  %v45_v58 = vld [vmem:[%s2265_s0 + $0xc8] sm:$0xff]  ;;  %v46_v62 = vld [vmem:[%s2265_s0 + $0xd0] sm:$0xff] }
   0xc   :  { %1233 = vmatpush.msra.mxu2 %v560_v16  ;;  %v47_v2 = vld [vmem:[%s2265_s0 + $0xd8] sm:$0xff]  ;;  %v54_v14 = vld [vmem:[%s2265_s0 + $0x110] sm:$0xff] }
   0xd   :  { %775 = vmatpush.msra.mxu1 %v559_v18  ;;  %v50_v16 = vld [vmem:[%s2265_s0 + $0xf0] sm:$0xff] }
   0xe   :  { %1234 = vmatpush.msra.mxu2 %v559_v18 }
  0x13   :  { %1104 = vmatmul.msk.f32.gmra.mxu0 %vm89_vm1, %v22_v3 }
  0x1b   :  { %1105 = vmatmul.msk.f32.gmra.mxu0 %vm89_vm1, %v23_v4 }
  0x23   :  { %1106 = vmatmul.msk.f32.gmra.mxu0 %vm89_vm1, %v24_v5 }
  0x2b   :  { %1107 = vmatmul.msk.f32.gmra.mxu0 %vm89_vm1, %v25_v6  ;;  %v48_v6 = vld [vmem:[%s2265_s0 + $0xe0] sm:$0xff] }
  0x33   :  { %1108 = vmatmul.msk.f32.gmra.mxu0 %vm89_vm1, %v26_v7 }
  0x3b   :  { %1109 = vmatmul.msk.f32.gmra.mxu0 %vm89_vm1, %v27_v8 }
  0x43   :  { %1110 = vmatmul.msk.f32.gmra.mxu0 %vm89_vm1, %v28_v9  ;;  %v53_v9 = vld [vmem:[%s2265_s0 + $0x108] sm:$0xff] }
  0x44   :  { %1135 = vmatmul.msk.f32.vlgmr.msra.gmra.mxu3 %vm89_vm1, %v53_v9 }
  0x4b   :  { %1111 = vmatmul.msk.f32.gmra.mxu0 %vm89_vm1, %v29_v10 }
  0x4c   :  { %1136 = vmatmul.msk.f32.gmra.mxu3 %vm89_vm1, %v54_v14 }
  0x53   :  { %1112 = vmatmul.msk.f32.gmra.mxu0 %vm89_vm1, %v30_v11  ;;  %v49_v11 = vld [vmem:[%s2265_s0 + $0xe8] sm:$0xff] }
  0x5b   :  { %1113 = vmatmul.msk.f32.gmra.mxu0 %vm89_vm1, %v31_v12 }
  0x63   :  { %1114 = vmatmul.msk.f32.gmra.mxu0 %vm89_vm1, %v32_v13 }
  0x6b   :  { %1115 = vmatmul.msk.f32.gmra.mxu0 %vm89_vm1, %v33_v17 }
  0x73   :  { %1116 = vmatmul.msk.f32.gmra.mxu0 %vm89_vm1, %v34_v19  ;;  %v55_v19 = vld [vmem:[%s2265_s0 + $0x118] sm:$0xff] }
  0x74   :  { %1137 = vmatmul.msk.f32.gmra.mxu3 %vm89_vm1, %v55_v19 }
  0x7b   :  { %1117 = vmatmul.msk.f32.gmra.mxu0 %vm89_vm1, %v35_v20 }
  0x80   :  { %v303_v22 = vpop.f32.mrf.mxu0 }
  0x81   :  { %v304_v24 = vadd.f32 %v1607_v21, %v303_v22  ;;  %v51_v22 = vld [vmem:[%s2265_s0 + $0xf8] sm:$0xff] }
  0x83   :  { %1237 = vtanh.f32 %v304_v24  ;;  %1118 = vmatmul.msk.f32.gmra.mxu0 %vm89_vm1, %v36_v23 }
  0x88   :  { %v306_v25 = vpop.f32.mrf.mxu0 }
  0x89   :  { %v1238_v27 = vpop.eup %1237  ;;  %v307_v28 = vadd.f32 %v1607_v21, %v306_v25  ;;  %v56_v25 = vld [vmem:[%s2265_s0 + $0x120] sm:$0xff] }
  0x8a   :  { %1166 = vmatmul.msk.f32.vlgmr.msra.gmra.mxu1 %vm567_vm2, %v1238_v27  ;;  %1138 = vmatmul.msk.f32.gmra.mxu3 %vm89_vm1, %v56_v25  ;;  %v52_v27 = vld [vmem:[%s2265_s0 + $0x100] sm:$0xff] }
  0x8b   :  { %1239 = vtanh.f32 %v307_v28  ;;  %1119 = vmatmul.msk.f32.gmra.mxu0 %vm89_vm1, %v37_v26 }
  0x90   :  { %v309_v29 = vpop.f32.mrf.mxu0 }
  0x91   :  { %v1240_v31 = vpop.eup %1239  ;;  %v310_v32 = vadd.f32 %v1607_v21, %v309_v29 }
  0x92   :  { %1167 = vmatmul.msk.f32.gmra.mxu1 %vm567_vm2, %v1240_v31  ;;  %v57_v31 = vld [vmem:[%s2265_s0 + $0x128] sm:$0xff] }
  0x93   :  { %1241 = vtanh.f32 %v310_v32  ;;  %1120 = vmatmul.msk.f32.gmra.mxu0 %vm89_vm1, %v38_v30  ;;  %v1729_v30 = vld [vmem:[%s2268_s4] ss:$0 sm:$0xff]  ;;  %1139 = vmatmul.msk.f32.gmra.mxu3 %vm89_vm1, %v57_v31  ;;  %v66_v31 = vld [vmem:[%s2265_s0 + $0x170] sm:$0xff] }
  0x98   :  { %v312_v33 = vpop.f32.mrf.mxu0 }
  0x99   :  { %v1242_v35 = vpop.eup %1241  ;;  %v313_v36 = vadd.f32 %v1607_v21, %v312_v33 }
  0x9a   :  { %1168 = vmatmul.msk.f32.gmra.mxu1 %vm567_vm2, %v1242_v35 }
  0x9b   :  { %1243 = vtanh.f32 %v313_v36  ;;  %1121 = vmatmul.msk.f32.gmra.mxu0 %vm89_vm1, %v39_v34 }
  0xa0   :  { %v315_v37 = vpop.f32.mrf.mxu0 }
  0xa1   :  { %v1244_v39 = vpop.eup %1243  ;;  %v316_v40 = vadd.f32 %v1607_v21, %v315_v37  ;;  %v58_v37 = vld [vmem:[%s2265_s0 + $0x130] sm:$0xff] }
  0xa2   :  { %1169 = vmatmul.msk.f32.gmra.mxu1 %vm567_vm2, %v1244_v39  ;;  %1140 = vmatmul.msk.f32.gmra.mxu3 %vm89_vm1, %v58_v37 }
  0xa3   :  { %1245 = vtanh.f32 %v316_v40  ;;  %1122 = vmatmul.msk.f32.gmra.mxu0 %vm89_vm1, %v40_v38 }
  0xa8   :  { %v318_v41 = vpop.f32.mrf.mxu0 }
  0xa9   :  { %v1246_v43 = vpop.eup %1245  ;;  %v319_v44 = vadd.f32 %v1607_v21, %v318_v41 }
  0xaa   :  { %1170 = vmatmul.msk.f32.gmra.mxu1 %vm567_vm2, %v1246_v43 }
  0xab   :  { %1247 = vtanh.f32 %v319_v44  ;;  %1123 = vmatmul.msk.f32.gmra.mxu0 %vm89_vm1, %v41_v42  ;;  %v59_v44 = vld [vmem:[%s2265_s0 + $0x138] sm:$0xff] }
  0xac   :  { %1141 = vmatmul.msk.f32.gmra.mxu3 %vm89_vm1, %v59_v44 }
  0xb0   :  { %v321_v45 = vpop.f32.mrf.mxu0 }
  0xb1   :  { %v1248_v47 = vpop.eup %1247  ;;  %v322_v48 = vadd.f32 %v1607_v21, %v321_v45 }
  0xb2   :  { %1171 = vmatmul.msk.f32.gmra.mxu1 %vm567_vm2, %v1248_v47 }
  0xb3   :  { %1249 = vtanh.f32 %v322_v48  ;;  %1124 = vmatmul.msk.f32.gmra.mxu0 %vm89_vm1, %v42_v46 }
  0xb8   :  { %v324_v49 = vpop.f32.mrf.mxu0 }
  0xb9   :  { %v1250_v51 = vpop.eup %1249  ;;  %v325_v52 = vadd.f32 %v1607_v21, %v324_v49 }
  0xba   :  { %1172 = vmatmul.msk.f32.gmra.mxu1 %vm567_vm2, %v1250_v51  ;;  %v60_v51 = vld [vmem:[%s2265_s0 + $0x140] sm:$0xff] }
  0xbb   :  { %1251 = vtanh.f32 %v325_v52  ;;  %1125 = vmatmul.msk.f32.gmra.mxu0 %vm89_vm1, %v43_v50  ;;  %1142 = vmatmul.msk.f32.gmra.mxu3 %vm89_vm1, %v60_v51 }
  0xc0   :  { %v327_v53 = vpop.f32.mrf.mxu0 }
  0xc1   :  { %v1252_v55 = vpop.eup %1251  ;;  %v328_v56 = vadd.f32 %v1607_v21, %v327_v53 }
  0xc2   :  { %1173 = vmatmul.msk.f32.gmra.mxu1 %vm567_vm2, %v1252_v55 }
  0xc3   :  { %1253 = vtanh.f32 %v328_v56  ;;  %1126 = vmatmul.msk.f32.gmra.mxu0 %vm89_vm1, %v44_v54 }
  0xc8   :  { %v330_v57 = vpop.f32.mrf.mxu0 }
  0xc9   :  { %v1254_v59 = vpop.eup %1253  ;;  %v331_v60 = vadd.f32 %v1607_v21, %v330_v57 }
  0xca   :  { %1174 = vmatmul.msk.f32.gmra.mxu1 %vm567_vm2, %v1254_v59 }
  0xcb   :  { %1255 = vtanh.f32 %v331_v60  ;;  %1127 = vmatmul.msk.f32.gmra.mxu0 %vm89_vm1, %v45_v58  ;;  %v61_v58 = vld [vmem:[%s2265_s0 + $0x148] sm:$0xff] }
  0xcc   :  { %1143 = vmatmul.msk.f32.gmra.mxu3 %vm89_vm1, %v61_v58 }
  0xd0   :  { %v333_v61 = vpop.f32.mrf.mxu0 }
  0xd1   :  { %v1256_v63 = vpop.eup %1255  ;;  %v334_v0 = vadd.f32 %v1607_v21, %v333_v61 }
  0xd2   :  { %1175 = vmatmul.msk.f32.gmra.mxu1 %vm567_vm2, %v1256_v63 }
  0xd3   :  { %1257 = vtanh.f32 %v334_v0  ;;  %1128 = vmatmul.msk.f32.gmra.mxu0 %vm89_vm1, %v46_v62 }
  0xd8   :  { %v336_v1 = vpop.f32.mrf.mxu0 }
  0xd9   :  { %v1258_v3 = vpop.eup %1257  ;;  %v337_v4 = vadd.f32 %v1607_v21, %v336_v1  ;;  %v62_v1 = vld [vmem:[%s2265_s0 + $0x150] sm:$0xff] }
  0xda   :  { %1176 = vmatmul.msk.f32.gmra.mxu1 %vm567_vm2, %v1258_v3  ;;  %1144 = vmatmul.msk.f32.gmra.mxu3 %vm89_vm1, %v62_v1 }
  0xdb   :  { %1259 = vtanh.f32 %v337_v4  ;;  %1129 = vmatmul.msk.f32.gmra.mxu0 %vm89_vm1, %v47_v2 }
  0xe0   :  { %v339_v5 = vpop.f32.mrf.mxu0 }
  0xe1   :  { %v1260_v7 = vpop.eup %1259  ;;  %v340_v8 = vadd.f32 %v1607_v21, %v339_v5 }
  0xe2   :  { %1177 = vmatmul.msk.f32.gmra.mxu1 %vm567_vm2, %v1260_v7 }
  0xe3   :  { %1261 = vtanh.f32 %v340_v8  ;;  %1130 = vmatmul.msk.f32.gmra.mxu0 %vm89_vm1, %v48_v6  ;;  %v63_v8 = vld [vmem:[%s2265_s0 + $0x158] sm:$0xff] }
  0xe4   :  { %1145 = vmatmul.msk.f32.gmra.mxu3 %vm89_vm1, %v63_v8 }
  0xe8   :  { %v342_v10 = vpop.f32.mrf.mxu0 }
  0xe9   :  { %v1262_v12 = vpop.eup %1261  ;;  %v343_v13 = vadd.f32 %v1607_v21, %v342_v10 }
  0xea   :  { %1178 = vmatmul.msk.f32.gmra.mxu1 %vm567_vm2, %v1262_v12 }
  0xeb   :  { %1263 = vtanh.f32 %v343_v13  ;;  %1131 = vmatmul.msk.f32.gmra.mxu0 %vm89_vm1, %v49_v11 }
  0xf0   :  { %v345_v15 = vpop.f32.mrf.mxu0 }
  0xf1   :  { %v1264_v17 = vpop.eup %1263  ;;  %v346_v18 = vadd.f32 %v1607_v21, %v345_v15  ;;  %v64_v15 = vld [vmem:[%s2265_s0 + $0x160] sm:$0xff] }
  0xf2   :  { %1179 = vmatmul.msk.f32.gmra.mxu1 %vm567_vm2, %v1264_v17  ;;  %1146 = vmatmul.msk.f32.gmra.mxu3 %vm89_vm1, %v64_v15 }
  0xf3   :  { %1265 = vtanh.f32 %v346_v18  ;;  %1132 = vmatmul.msk.f32.gmra.mxu0 %vm89_vm1, %v50_v16 }
  0xf8   :  { %v348_v20 = vpop.f32.mrf.mxu0 }
  0xf9   :  { %v1266_v23 = vpop.eup %1265  ;;  %v349_v24 = vadd.f32 %v1607_v21, %v348_v20 }
  0xfa   :  { %1180 = vmatmul.msk.f32.gmra.mxu1 %vm567_vm2, %v1266_v23  ;;  %v65_v23 = vld [vmem:[%s2265_s0 + $0x168] sm:$0xff] }
  0xfb   :  { %1267 = vtanh.f32 %v349_v24  ;;  %1133 = vmatmul.msk.f32.gmra.mxu0 %vm89_vm1, %v51_v22  ;;  %1147 = vmatmul.msk.f32.gmra.mxu3 %vm89_vm1, %v65_v23 }
 0x100   :  { %v351_v26 = vpop.f32.mrf.mxu0 }
 0x101   :  { %v1268_v28 = vpop.eup %1267  ;;  %v352_v29 = vadd.f32 %v1607_v21, %v351_v26 }
 0x102   :  { %1181 = vmatmul.msk.f32.gmra.mxu1 %vm567_vm2, %v1268_v28 }
 0x103   :  { %1269 = vtanh.f32 %v352_v29  ;;  %1134 = vmatmul.msk.f32.gmra.mxu0 %vm89_vm1, %v52_v27  ;;  %1148 = vmatmul.msk.f32.gmra.mxu3 %vm89_vm1, %v66_v31 }
 0x107   :  { %v777_v32 = vpop.f32.mrf.mxu1 }
 0x108   :  { %v778_v33 = vadd.f32 %v1729_v30, %v777_v32  ;;  %v354_v34 = vpop.f32.mrf.mxu0 }
 0x109   :  { %v1270_v35 = vpop.eup %1269  ;;  %v355_v36 = vadd.f32 %v1607_v21, %v354_v34 }
 0x10a   :  { %1271 = vtanh.f32 %v778_v33  ;;  %1182 = vmatmul.msk.f32.gmra.mxu1 %vm567_vm2, %v1270_v35 }
 0x10b   :  { %1273 = vtanh.f32 %v355_v36 }
 0x10f   :  { %v780_v38 = vpop.f32.mrf.mxu1 }
 0x110   :  { %v1272_v39 = vpop.eup %1271  ;;  %v781_v40 = vadd.f32 %v1729_v30, %v780_v38  ;;  %v357_v41 = vpop.f32.mrf.mxu0  ;;  %v67_v38 = vld [vmem:[%s2265_s0 + $0x178] sm:$0xff] }
 0x111   :  { %v1274_v42 = vpop.eup %1273  ;;  %1033 = vst.msk [vmem:[%s2269_s5] sm:$0xff] %vm567_vm2, %v1272_v39  ;;  %v358_v43 = vadd.f32 %v1607_v21, %v357_v41  ;;  %1149 = vmatmul.msk.f32.gmra.mxu3 %vm89_vm1, %v67_v38 }
 0x112   :  { %1275 = vtanh.f32 %v781_v40  ;;  %1183 = vmatmul.msk.f32.gmra.mxu1 %vm567_vm2, %v1274_v42 }
 0x113   :  { %1277 = vtanh.f32 %v358_v43 }
 0x117   :  { %v783_v45 = vpop.f32.mrf.mxu1 }
 0x118   :  { %v1276_v46 = vpop.eup %1275  ;;  %v784_v47 = vadd.f32 %v1729_v30, %v783_v45  ;;  %v360_v48 = vpop.f32.mrf.mxu0  ;;  %v68_v45 = vld [vmem:[%s2265_s0 + $0x180] sm:$0xff] }
 0x119   :  { %v1278_v49 = vpop.eup %1277  ;;  %1034 = vst.msk [vmem:[%s2269_s5 + $0x8] sm:$0xff] %vm567_vm2, %v1276_v46  ;;  %v361_v50 = vadd.f32 %v1607_v21, %v360_v48  ;;  %1150 = vmatmul.msk.f32.gmra.mxu3 %vm89_vm1, %v68_v45 }
 0x11a   :  { %1279 = vtanh.f32 %v784_v47  ;;  %1184 = vmatmul.msk.f32.gmra.mxu1 %vm567_vm2, %v1278_v49 }
 0x11b   :  { %1281 = vtanh.f32 %v361_v50 }
 0x11f   :  { %v786_v52 = vpop.f32.mrf.mxu1 }
 0x120   :  { %v1280_v53 = vpop.eup %1279  ;;  %v787_v54 = vadd.f32 %v1729_v30, %v786_v52  ;;  %v363_v55 = vpop.f32.mrf.mxu0  ;;  %v69_v52 = vld [vmem:[%s2265_s0 + $0x188] sm:$0xff] }
 0x121   :  { %v1282_v56 = vpop.eup %1281  ;;  %1035 = vst.msk [vmem:[%s2269_s5 + $0x10] sm:$0xff] %vm567_vm2, %v1280_v53  ;;  %v364_v57 = vadd.f32 %v1607_v21, %v363_v55  ;;  %1151 = vmatmul.msk.f32.gmra.mxu3 %vm89_vm1, %v69_v52 }
 0x122   :  { %1283 = vtanh.f32 %v787_v54  ;;  %1185 = vmatmul.msk.f32.gmra.mxu1 %vm567_vm2, %v1282_v56 }
 0x123   :  { %1285 = vtanh.f32 %v364_v57  ;;  %v402_v57 = vpop.f32.mrf.mxu3 }
 0x127   :  { %v789_v59 = vpop.f32.mrf.mxu1 }
 0x128   :  { %v1284_v60 = vpop.eup %1283  ;;  %v790_v61 = vadd.f32 %v1729_v30, %v789_v59  ;;  %v366_v62 = vpop.f32.mrf.mxu0 }
 0x129   :  { %v1286_v63 = vpop.eup %1285  ;;  %1036 = vst.msk [vmem:[%s2269_s5 + $0x18] sm:$0xff] %vm567_vm2, %v1284_v60  ;;  %v367_v0 = vadd.f32 %v1607_v21, %v366_v62  ;;  %v70_v60 = vld [vmem:[%s2265_s0 + $0x190] sm:$0xff] }
 0x12a   :  { %1287 = vtanh.f32 %v790_v61  ;;  %1186 = vmatmul.msk.f32.gmra.mxu1 %vm567_vm2, %v1286_v63  ;;  %1152 = vmatmul.msk.f32.gmra.mxu3 %vm89_vm1, %v70_v60 }
 0x12b   :  { %1289 = vtanh.f32 %v367_v0  ;;  %v405_v1 = vpop.f32.mrf.mxu3 }
 0x12f   :  { %v792_v2 = vpop.f32.mrf.mxu1 }
 0x130   :  { %v1288_v3 = vpop.eup %1287  ;;  %v793_v4 = vadd.f32 %v1729_v30, %v792_v2  ;;  %v369_v5 = vpop.f32.mrf.mxu0 }
 0x131   :  { %v1290_v6 = vpop.eup %1289  ;;  %1037 = vst.msk [vmem:[%s2269_s5 + $0x20] sm:$0xff] %vm567_vm2, %v1288_v3  ;;  %v370_v7 = vadd.f32 %v1607_v21, %v369_v5 }
 0x132   :  { %1291 = vtanh.f32 %v793_v4  ;;  %1187 = vmatmul.msk.f32.gmra.mxu1 %vm567_vm2, %v1290_v6  ;;  %v71_v4 = vld [vmem:[%s2265_s0 + $0x198] sm:$0xff] }
 0x133   :  { %1293 = vtanh.f32 %v370_v7  ;;  %1153 = vmatmul.msk.f32.gmra.mxu3 %vm89_vm1, %v71_v4 }
 0x137   :  { %v795_v9 = vpop.f32.mrf.mxu1 }
 0x138   :  { %v1292_v10 = vpop.eup %1291  ;;  %v796_v11 = vadd.f32 %v1729_v30, %v795_v9  ;;  %v372_v12 = vpop.f32.mrf.mxu0 }
 0x139   :  { %v1294_v13 = vpop.eup %1293  ;;  %1038 = vst.msk [vmem:[%s2269_s5 + $0x28] sm:$0xff] %vm567_vm2, %v1292_v10  ;;  %v373_v14 = vadd.f32 %v1607_v21, %v372_v12  ;;  %v408_v9 = vpop.f32.mrf.mxu3  ;;  %v72_v12 = vld [vmem:[%s2265_s0 + $0x1a0] sm:$0xff] }
 0x13a   :  { %1295 = vtanh.f32 %v796_v11  ;;  %1188 = vmatmul.msk.f32.gmra.mxu1 %vm567_vm2, %v1294_v13 }
 0x13b   :  { %1297 = vtanh.f32 %v373_v14  ;;  %1154 = vmatmul.msk.f32.gmra.mxu3 %vm89_vm1, %v72_v12 }
 0x13f   :  { %v798_v16 = vpop.f32.mrf.mxu1 }
 0x140   :  { %v1296_v17 = vpop.eup %1295  ;;  %v799_v18 = vadd.f32 %v1729_v30, %v798_v16  ;;  %v375_v19 = vpop.f32.mrf.mxu0 }
 0x141   :  { %v1298_v20 = vpop.eup %1297  ;;  %1039 = vst.msk [vmem:[%s2269_s5 + $0x30] sm:$0xff] %vm567_vm2, %v1296_v17  ;;  %v376_v22 = vadd.f32 %v1607_v21, %v375_v19  ;;  %v411_v17 = vpop.f32.mrf.mxu3 }
 0x142   :  { %1299 = vtanh.f32 %v799_v18  ;;  %1189 = vmatmul.msk.f32.gmra.mxu1 %vm567_vm2, %v1298_v20  ;;  %v73_v20 = vld [vmem:[%s2265_s0 + $0x1a8] sm:$0xff] }
 0x143   :  { %1301 = vtanh.f32 %v376_v22  ;;  %v403_v22 = vadd.f32 %v1607_v21, %v402_v57  ;;  %1155 = vmatmul.msk.f32.gmra.mxu3 %vm89_vm1, %v73_v20  ;;  %v78_v57 = vld [vmem:[%s2265_s0 + $0x1d0] sm:$0xff] }
 0x147   :  { %v801_v24 = vpop.f32.mrf.mxu1 }
 0x148   :  { %v1300_v25 = vpop.eup %1299  ;;  %v802_v26 = vadd.f32 %v1729_v30, %v801_v24  ;;  %v378_v27 = vpop.f32.mrf.mxu0 }
 0x149   :  { %v1302_v28 = vpop.eup %1301  ;;  %1040 = vst.msk [vmem:[%s2269_s5 + $0x38] sm:$0xff] %vm567_vm2, %v1300_v25  ;;  %v379_v29 = vadd.f32 %v1607_v21, %v378_v27 }
 0x14a   :  { %1303 = vtanh.f32 %v802_v26  ;;  %1190 = vmatmul.msk.f32.gmra.mxu1 %vm567_vm2, %v1302_v28  ;;  %v414_v26 = vpop.f32.mrf.mxu3  ;;  %v74_v28 = vld [vmem:[%s2265_s0 + $0x1b0] sm:$0xff] }
 0x14b   :  { %1305 = vtanh.f32 %v379_v29  ;;  %v406_v29 = vadd.f32 %v1607_v21, %v405_v1  ;;  %1156 = vmatmul.msk.f32.gmra.mxu3 %vm89_vm1, %v74_v28 }
 0x14f   :  { %v804_v32 = vpop.f32.mrf.mxu1 }
 0x150   :  { %v1304_v33 = vpop.eup %1303  ;;  %v805_v34 = vadd.f32 %v1729_v30, %v804_v32  ;;  %v381_v35 = vpop.f32.mrf.mxu0 }
 0x151   :  { %v1306_v36 = vpop.eup %1305  ;;  %1041 = vst.msk [vmem:[%s2269_s5 + $0x40] sm:$0xff] %vm567_vm2, %v1304_v33  ;;  %v382_v37 = vadd.f32 %v1607_v21, %v381_v35 }
 0x152   :  { %1307 = vtanh.f32 %v805_v34  ;;  %1191 = vmatmul.msk.f32.gmra.mxu1 %vm567_vm2, %v1306_v36  ;;  %v417_v35 = vpop.f32.mrf.mxu3  ;;  %v75_v36 = vld [vmem:[%s2265_s0 + $0x1b8] sm:$0xff] }
 0x153   :  { %1309 = vtanh.f32 %v382_v37  ;;  %v409_v37 = vadd.f32 %v1607_v21, %v408_v9  ;;  %1157 = vmatmul.msk.f32.gmra.mxu3 %vm89_vm1, %v75_v36 }
 0x157   :  { %v807_v39 = vpop.f32.mrf.mxu1 }
 0x158   :  { %v1308_v40 = vpop.eup %1307  ;;  %v808_v41 = vadd.f32 %v1729_v30, %v807_v39  ;;  %v384_v42 = vpop.f32.mrf.mxu0 }
 0x159   :  { %v1310_v43 = vpop.eup %1309  ;;  %1042 = vst.msk [vmem:[%s2269_s5 + $0x48] sm:$0xff] %vm567_vm2, %v1308_v40  ;;  %v385_v44 = vadd.f32 %v1607_v21, %v384_v42 }
 0x15a   :  { %1311 = vtanh.f32 %v808_v41  ;;  %1192 = vmatmul.msk.f32.gmra.mxu1 %vm567_vm2, %v1310_v43  ;;  %v420_v42 = vpop.f32.mrf.mxu3  ;;  %v76_v43 = vld [vmem:[%s2265_s0 + $0x1c0] sm:$0xff] }
 0x15b   :  { %1313 = vtanh.f32 %v385_v44  ;;  %v412_v44 = vadd.f32 %v1607_v21, %v411_v17  ;;  %1158 = vmatmul.msk.f32.gmra.mxu3 %vm89_vm1, %v76_v43  ;;  %v421_v1 = vadd.f32 %v1607_v21, %v420_v42 }
 0x15f   :  { %v810_v46 = vpop.f32.mrf.mxu1 }
 0x160   :  { %v1312_v47 = vpop.eup %1311  ;;  %v811_v48 = vadd.f32 %v1729_v30, %v810_v46  ;;  %v387_v49 = vpop.f32.mrf.mxu0 }
 0x161   :  { %v1314_v50 = vpop.eup %1313  ;;  %1043 = vst.msk [vmem:[%s2269_s5 + $0x50] sm:$0xff] %vm567_vm2, %v1312_v47  ;;  %v388_v51 = vadd.f32 %v1607_v21, %v387_v49 }
 0x162   :  { %1315 = vtanh.f32 %v811_v48  ;;  %1193 = vmatmul.msk.f32.gmra.mxu1 %vm567_vm2, %v1314_v50  ;;  %v423_v49 = vpop.f32.mrf.mxu3  ;;  %v77_v50 = vld [vmem:[%s2265_s0 + $0x1c8] sm:$0xff] }
 0x163   :  { %1317 = vtanh.f32 %v388_v51  ;;  %v415_v51 = vadd.f32 %v1607_v21, %v414_v26  ;;  %1159 = vmatmul.msk.f32.gmra.mxu3 %vm89_vm1, %v77_v50 }
 0x167   :  { %v813_v53 = vpop.f32.mrf.mxu1 }
 0x168   :  { %v1316_v54 = vpop.eup %1315  ;;  %v814_v55 = vadd.f32 %v1729_v30, %v813_v53  ;;  %v390_v56 = vpop.f32.mrf.mxu0 }
 0x169   :  { %v1318_v58 = vpop.eup %1317  ;;  %1044 = vst.msk [vmem:[%s2269_s5 + $0x58] sm:$0xff] %vm567_vm2, %v1316_v54  ;;  %v391_v59 = vadd.f32 %v1607_v21, %v390_v56 }
 0x16a   :  { %1319 = vtanh.f32 %v814_v55  ;;  %1194 = vmatmul.msk.f32.gmra.mxu1 %vm567_vm2, %v1318_v58  ;;  %v426_v56 = vpop.f32.mrf.mxu3  ;;  %v418_v58 = vadd.f32 %v1607_v21, %v417_v35 }
 0x16b   :  { %1321 = vtanh.f32 %v391_v59  ;;  %1160 = vmatmul.msk.f32.gmra.mxu3 %vm89_vm1, %v78_v57 }
 0x16f   :  { %v816_v61 = vpop.f32.mrf.mxu1 }
 0x170   :  { %v1320_v62 = vpop.eup %1319  ;;  %v817_v63 = vadd.f32 %v1729_v30, %v816_v61  ;;  %v393_v0 = vpop.f32.mrf.mxu0 }
 0x171   :  { %v1322_v2 = vpop.eup %1321  ;;  %1045 = vst.msk [vmem:[%s2269_s5 + $0x60] sm:$0xff] %vm567_vm2, %v1320_v62  ;;  %v394_v3 = vadd.f32 %v1607_v21, %v393_v0  ;;  %v79_v0 = vld [vmem:[%s2265_s0 + $0x1d8] sm:$0xff] }
 0x172   :  { %1323 = vtanh.f32 %v817_v63  ;;  %1195 = vmatmul.msk.f32.gmra.mxu1 %vm567_vm2, %v1322_v2  ;;  %v429_v63 = vpop.f32.mrf.mxu3 }
 0x173   :  { %1325 = vtanh.f32 %v394_v3  ;;  %1161 = vmatmul.msk.f32.gmra.mxu3 %vm89_vm1, %v79_v0 }
 0x177   :  { %v819_v5 = vpop.f32.mrf.mxu1 }
 0x178   :  { %v1324_v6 = vpop.eup %1323  ;;  %v820_v7 = vadd.f32 %v1729_v30, %v819_v5  ;;  %v396_v8 = vpop.f32.mrf.mxu0 }
 0x179   :  { %v1326_v10 = vpop.eup %1325  ;;  %1046 = vst.msk [vmem:[%s2269_s5 + $0x68] sm:$0xff] %vm567_vm2, %v1324_v6  ;;  %v397_v11 = vadd.f32 %v1607_v21, %v396_v8  ;;  %v424_v8 = vadd.f32 %v1607_v21, %v423_v49 }
 0x17a   :  { %1327 = vtanh.f32 %v820_v7  ;;  %1196 = vmatmul.msk.f32.gmra.mxu1 %vm567_vm2, %v1326_v10  ;;  %v432_v6 = vpop.f32.mrf.mxu3  ;;  %v80_v7 = vld [vmem:[%s2265_s0 + $0x1e0] sm:$0xff] }
 0x17b   :  { %1329 = vtanh.f32 %v397_v11  ;;  %1162 = vmatmul.msk.f32.gmra.mxu3 %vm89_vm1, %v80_v7  ;;  %v2068_v7 = vld [vmem:[%s2266_s2] ss:$0 sm:$0xff] }
 0x17f   :  { %v822_v13 = vpop.f32.mrf.mxu1 }
 0x180   :  { %v1328_v14 = vpop.eup %1327  ;;  %v823_v15 = vadd.f32 %v1729_v30, %v822_v13  ;;  %v399_v16 = vpop.f32.mrf.mxu0 }
 0x181   :  { %v1330_v18 = vpop.eup %1329  ;;  %1047 = vst.msk [vmem:[%s2269_s5 + $0x70] sm:$0xff] %vm567_vm2, %v1328_v14  ;;  %v400_v19 = vadd.f32 %v1607_v21, %v399_v16  ;;  %v81_v14 = vld [vmem:[%s2265_s0 + $0x1e8] sm:$0xff] }
 0x182   :  { %1331 = vtanh.f32 %v823_v15  ;;  %1197 = vmatmul.msk.f32.gmra.mxu1 %vm567_vm2, %v1330_v18  ;;  %v435_v13 = vpop.f32.mrf.mxu3  ;;  %v427_v15 = vadd.f32 %v1607_v21, %v426_v56 }
 0x183   :  { %1333 = vtanh.f32 %v400_v19  ;;  %1163 = vmatmul.msk.f32.gmra.mxu3 %vm89_vm1, %v81_v14 }
 0x184   :  { %1335 = vtanh.f32 %v403_v22  ;;  %v82_v22 = vld [vmem:[%s2265_s0 + $0x1f0] sm:$0xff] }
 0x187   :  { %v825_v23 = vpop.f32.mrf.mxu1 }
 0x188   :  { %v1332_v24 = vpop.eup %1331  ;;  %v826_v25 = vadd.f32 %v1729_v30, %v825_v23  ;;  %v430_v23 = vadd.f32 %v1607_v21, %v429_v63 }
 0x189   :  { %v1334_v27 = vpop.eup %1333  ;;  %1048 = vst.msk [vmem:[%s2269_s5 + $0x78] sm:$0xff] %vm567_vm2, %v1332_v24 }
 0x18a   :  { %1337 = vtanh.f32 %v826_v25  ;;  %1198 = vmatmul.msk.f32.vlgmr.msra.gmra.mxu2 %vm567_vm2, %v1334_v27  ;;  %v1336_v31 = vpop.eup %1335  ;;  %v438_v20 = vpop.f32.mrf.mxu3 }
 0x18b   :  { %1339 = vtanh.f32 %v406_v29  ;;  %1164 = vmatmul.msk.f32.gmra.mxu3 %vm89_vm1, %v82_v22  ;;  %v83_v29 = vld [vmem:[%s2265_s0 + $0x1f8] sm:$0xff]  ;;  %v439_v43 = vadd.f32 %v1607_v21, %v438_v20 }
 0x18f   :  { %v828_v32 = vpop.f32.mrf.mxu1 }
 0x190   :  { %v1338_v33 = vpop.eup %1337  ;;  %v829_v34 = vadd.f32 %v1729_v30, %v828_v32 }
 0x191   :  { %1049 = vst.msk [vmem:[%s2269_s5 + $0x80] sm:$0xff] %vm567_vm2, %v1338_v33  ;;  %v1340_v38 = vpop.eup %1339 }
 0x192   :  { %1341 = vtanh.f32 %v829_v34  ;;  %1199 = vmatmul.msk.f32.gmra.mxu2 %vm567_vm2, %v1336_v31  ;;  %v441_v28 = vpop.f32.mrf.mxu3  ;;  %v433_v31 = vadd.f32 %v1607_v21, %v432_v6 }
 0x193   :  { %1343 = vtanh.f32 %v409_v37  ;;  %1165 = vmatmul.msk.f32.gmra.mxu3 %vm89_vm1, %v83_v29  ;;  %v436_v37 = vadd.f32 %v1607_v21, %v435_v13  ;;  %v442_v49 = vadd.f32 %v1607_v21, %v441_v28 }
 0x197   :  { %v831_v39 = vpop.f32.mrf.mxu1 }
 0x198   :  { %v1342_v40 = vpop.eup %1341  ;;  %v832_v41 = vadd.f32 %v1729_v30, %v831_v39 }
 0x199   :  { %1050 = vst.msk [vmem:[%s2269_s5 + $0x88] sm:$0xff] %vm567_vm2, %v1342_v40  ;;  %v1344_v45 = vpop.eup %1343 }
 0x19a   :  { %1345 = vtanh.f32 %v832_v41  ;;  %1200 = vmatmul.msk.f32.gmra.mxu2 %vm567_vm2, %v1340_v38  ;;  %v444_v36 = vpop.f32.mrf.mxu3 }
 0x19b   :  { %1347 = vtanh.f32 %v412_v44 }
 0x19f   :  { %v834_v46 = vpop.f32.mrf.mxu1 }
 0x1a0   :  { %v1346_v47 = vpop.eup %1345  ;;  %v835_v48 = vadd.f32 %v1729_v30, %v834_v46 }
 0x1a1   :  { %1051 = vst.msk [vmem:[%s2269_s5 + $0x90] sm:$0xff] %vm567_vm2, %v1346_v47  ;;  %v1348_v52 = vpop.eup %1347 }
 0x1a2   :  { %1349 = vtanh.f32 %v835_v48  ;;  %1201 = vmatmul.msk.f32.gmra.mxu2 %vm567_vm2, %v1344_v45  ;;  %v447_v42 = vpop.f32.mrf.mxu3 }
 0x1a3   :  { %1351 = vtanh.f32 %v415_v51 }
 0x1a7   :  { %v837_v53 = vpop.f32.mrf.mxu1 }
 0x1a8   :  { %v1350_v54 = vpop.eup %1349  ;;  %v838_v55 = vadd.f32 %v1729_v30, %v837_v53 }
 0x1a9   :  { %1052 = vst.msk [vmem:[%s2269_s5 + $0x98] sm:$0xff] %vm567_vm2, %v1350_v54  ;;  %v1352_v59 = vpop.eup %1351 }
 0x1aa   :  { %1353 = vtanh.f32 %v838_v55  ;;  %1202 = vmatmul.msk.f32.gmra.mxu2 %vm567_vm2, %v1348_v52  ;;  %v450_v48 = vpop.f32.mrf.mxu3  ;;  %v445_v55 = vadd.f32 %v1607_v21, %v444_v36 }
 0x1ab   :  { %1355 = vtanh.f32 %v418_v58 }
 0x1af   :  { %v840_v60 = vpop.f32.mrf.mxu1 }
 0x1b0   :  { %v1354_v61 = vpop.eup %1353  ;;  %v841_v62 = vadd.f32 %v1729_v30, %v840_v60 }
 0x1b1   :  { %1053 = vst.msk [vmem:[%s2269_s5 + $0xa0] sm:$0xff] %vm567_vm2, %v1354_v61  ;;  %v1356_v2 = vpop.eup %1355  ;;  %v448_v61 = vadd.f32 %v1607_v21, %v447_v42 }
 0x1b2   :  { %1357 = vtanh.f32 %v841_v62  ;;  %1203 = vmatmul.msk.f32.gmra.mxu2 %vm567_vm2, %v1352_v59  ;;  %v453_v54 = vpop.f32.mrf.mxu3 }
 0x1b3   :  { %1359 = vtanh.f32 %v421_v1 }
 0x1b7   :  { %v843_v3 = vpop.f32.mrf.mxu1 }
 0x1b8   :  { %v1358_v4 = vpop.eup %1357  ;;  %v844_v5 = vadd.f32 %v1729_v30, %v843_v3  ;;  %v451_v3 = vadd.f32 %v1607_v21, %v450_v48 }
 0x1b9   :  { %1054 = vst.msk [vmem:[%s2269_s5 + $0xa8] sm:$0xff] %vm567_vm2, %v1358_v4  ;;  %v1360_v9 = vpop.eup %1359 }
 0x1ba   :  { %1361 = vtanh.f32 %v844_v5  ;;  %1204 = vmatmul.msk.f32.gmra.mxu2 %vm567_vm2, %v1356_v2  ;;  %v456_v60 = vpop.f32.mrf.mxu3 }
 0x1bb   :  { %1363 = vtanh.f32 %v424_v8  ;;  %v454_v8 = vadd.f32 %v2068_v7, %v453_v54 }
 0x1bf   :  { %v846_v10 = vpop.f32.mrf.mxu1 }
 0x1c0   :  { %v1362_v11 = vpop.eup %1361  ;;  %v847_v12 = vadd.f32 %v1729_v30, %v846_v10 }
 0x1c1   :  { %1055 = vst.msk [vmem:[%s2269_s5 + $0xb0] sm:$0xff] %vm567_vm2, %v1362_v11  ;;  %v1364_v16 = vpop.eup %1363 }
 0x1c2   :  { %1365 = vtanh.f32 %v847_v12  ;;  %1205 = vmatmul.msk.f32.gmra.mxu2 %vm567_vm2, %v1360_v9  ;;  %v459_v2 = vpop.f32.mrf.mxu3  ;;  %v457_v12 = vadd.f32 %v2068_v7, %v456_v60 }
 0x1c3   :  { %1367 = vtanh.f32 %v427_v15 }
 0x1c7   :  { %v849_v17 = vpop.f32.mrf.mxu1 }
 0x1c8   :  { %v1366_v18 = vpop.eup %1365  ;;  %v850_v19 = vadd.f32 %v1729_v30, %v849_v17 }
 0x1c9   :  { %1056 = vst.msk [vmem:[%s2269_s5 + $0xb8] sm:$0xff] %vm567_vm2, %v1366_v18  ;;  %v1368_v24 = vpop.eup %1367  ;;  %v460_v18 = vadd.f32 %v2068_v7, %v459_v2 }
 0x1ca   :  { %1369 = vtanh.f32 %v850_v19  ;;  %1206 = vmatmul.msk.f32.gmra.mxu2 %vm567_vm2, %v1364_v16  ;;  %v462_v9 = vpop.f32.mrf.mxu3 }
 0x1cb   :  { %1371 = vtanh.f32 %v430_v23 }
 0x1cf   :  { %v852_v25 = vpop.f32.mrf.mxu1 }
 0x1d0   :  { %v1370_v26 = vpop.eup %1369  ;;  %v853_v27 = vadd.f32 %v1729_v30, %v852_v25  ;;  %v463_v25 = vadd.f32 %v2068_v7, %v462_v9 }
 0x1d1   :  { %1057 = vst.msk [vmem:[%s2269_s5 + $0xc0] sm:$0xff] %vm567_vm2, %v1370_v26  ;;  %v1372_v32 = vpop.eup %1371 }
 0x1d2   :  { %1373 = vtanh.f32 %v853_v27  ;;  %1207 = vmatmul.msk.f32.gmra.mxu2 %vm567_vm2, %v1368_v24  ;;  %v465_v16 = vpop.f32.mrf.mxu3 }
 0x1d3   :  { %1375 = vtanh.f32 %v433_v31 }
 0x1d7   :  { %v855_v33 = vpop.f32.mrf.mxu1 }
 0x1d8   :  { %v1374_v34 = vpop.eup %1373  ;;  %v856_v35 = vadd.f32 %v1729_v30, %v855_v33 }
 0x1d9   :  { %1058 = vst.msk [vmem:[%s2269_s5 + $0xc8] sm:$0xff] %vm567_vm2, %v1374_v34  ;;  %v1376_v38 = vpop.eup %1375 }
 0x1da   :  { %1377 = vtanh.f32 %v856_v35  ;;  %1208 = vmatmul.msk.f32.gmra.mxu2 %vm567_vm2, %v1372_v32  ;;  %v468_v23 = vpop.f32.mrf.mxu3  ;;  %v466_v32 = vadd.f32 %v2068_v7, %v465_v16 }
 0x1db   :  { %1379 = vtanh.f32 %v436_v37  ;;  %v469_v37 = vadd.f32 %v2068_v7, %v468_v23  ;;  %v2161_v23 = vld [vmem:[%s2268_s4] ss:$0 sm:$0xff] }
 0x1df   :  { %v858_v39 = vpop.f32.mrf.mxu1 }
 0x1e0   :  { %v1378_v40 = vpop.eup %1377  ;;  %v859_v41 = vadd.f32 %v1729_v30, %v858_v39 }
 0x1e1   :  { %1059 = vst.msk [vmem:[%s2269_s5 + $0xd0] sm:$0xff] %vm567_vm2, %v1378_v40  ;;  %v1380_v44 = vpop.eup %1379 }
 0x1e2   :  { %1381 = vtanh.f32 %v859_v41  ;;  %1209 = vmatmul.msk.f32.gmra.mxu2 %vm567_vm2, %v1376_v38  ;;  %v471_v29 = vpop.f32.mrf.mxu3 }
 0x1e3   :  { %1383 = vtanh.f32 %v439_v43  ;;  %v472_v43 = vadd.f32 %v2068_v7, %v471_v29 }
 0x1e7   :  { %v861_v45 = vpop.f32.mrf.mxu1 }
 0x1e8   :  { %v1382_v46 = vpop.eup %1381  ;;  %v862_v47 = vadd.f32 %v1729_v30, %v861_v45 }
 0x1e9   :  { %1060 = vst.msk [vmem:[%s2269_s5 + $0xd8] sm:$0xff] %vm567_vm2, %v1382_v46  ;;  %v1384_v50 = vpop.eup %1383 }
 0x1ea   :  { %1385 = vtanh.f32 %v862_v47  ;;  %1210 = vmatmul.msk.f32.gmra.mxu2 %vm567_vm2, %v1380_v44  ;;  %v474_v40 = vpop.f32.mrf.mxu3 }
 0x1eb   :  { %1387 = vtanh.f32 %v442_v49  ;;  %v475_v49 = vadd.f32 %v2068_v7, %v474_v40 }
 0x1ef   :  { %v864_v51 = vpop.f32.mrf.mxu1 }
 0x1f0   :  { %v1386_v52 = vpop.eup %1385  ;;  %v865_v53 = vadd.f32 %v1729_v30, %v864_v51 }
 0x1f1   :  { %1061 = vst.msk [vmem:[%s2269_s5 + $0xe0] sm:$0xff] %vm567_vm2, %v1386_v52  ;;  %v1388_v56 = vpop.eup %1387 }
 0x1f2   :  { %1389 = vtanh.f32 %v865_v53  ;;  %1211 = vmatmul.msk.f32.gmra.mxu2 %vm567_vm2, %v1384_v50  ;;  %v477_v47 = vpop.f32.mrf.mxu3 }
 0x1f3   :  { %1391 = vtanh.f32 %v445_v55  ;;  %v478_v55 = vadd.f32 %v2068_v7, %v477_v47 }
 0x1f7   :  { %v867_v57 = vpop.f32.mrf.mxu1 }
 0x1f8   :  { %v1390_v58 = vpop.eup %1389  ;;  %v868_v59 = vadd.f32 %v1729_v30, %v867_v57 }
 0x1f9   :  { %1062 = vst.msk [vmem:[%s2269_s5 + $0xe8] sm:$0xff] %vm567_vm2, %v1390_v58  ;;  %v1392_v62 = vpop.eup %1391 }
 0x1fa   :  { %1393 = vtanh.f32 %v868_v59  ;;  %1212 = vmatmul.msk.f32.gmra.mxu2 %vm567_vm2, %v1388_v56  ;;  %v480_v53 = vpop.f32.mrf.mxu3 }
 0x1fb   :  { %1395 = vtanh.f32 %v448_v61  ;;  %v481_v61 = vadd.f32 %v2068_v7, %v480_v53 }
 0x1ff   :  { %v870_v63 = vpop.f32.mrf.mxu1 }
 0x200   :  { %v1394_v0 = vpop.eup %1393  ;;  %v871_v1 = vadd.f32 %v1729_v30, %v870_v63 }
 0x201   :  { %1063 = vst.msk [vmem:[%s2269_s5 + $0xf0] sm:$0xff] %vm567_vm2, %v1394_v0  ;;  %v1396_v4 = vpop.eup %1395 }
 0x202   :  { %1397 = vtanh.f32 %v871_v1  ;;  %1213 = vmatmul.msk.f32.gmra.mxu2 %vm567_vm2, %v1392_v62  ;;  %v483_v59 = vpop.f32.mrf.mxu3 }
 0x203   :  { %1399 = vtanh.f32 %v451_v3  ;;  %v484_v2 = vadd.f32 %v2068_v7, %v483_v59 }
 0x208   :  { %v1398_v5 = vpop.eup %1397 }
 0x209   :  { %1064 = vst.msk [vmem:[%s2269_s5 + $0xf8] sm:$0xff] %vm567_vm2, %v1398_v5  ;;  %v1400_v10 = vpop.eup %1399 }
 0x20a   :  { %1214 = vmatmul.msk.f32.gmra.mxu2 %vm567_vm2, %v1396_v4  ;;  %v486_v5 = vpop.f32.mrf.mxu3 }
 0x20d   :  { %v873_v6 = vpop.f32.mrf.mxu2 }
 0x20e   :  { %v874_v21 = vadd.f32 %v1729_v30, %v873_v6 }
 0x210   :  { %1401 = vtanh.f32 %v874_v21  ;;  %v487_v21 = vadd.f32 %v2068_v7, %v486_v5 }
 0x211   :  { %1403 = vtanh.f32 %v454_v8 }
 0x212   :  { %1215 = vmatmul.msk.f32.gmra.mxu2 %vm567_vm2, %v1400_v10 }
 0x215   :  { %v876_v11 = vpop.f32.mrf.mxu2 }
 0x216   :  { %v1402_v13 = vpop.eup %1401  ;;  %v877_v14 = vadd.f32 %v1729_v30, %v876_v11 }
 0x217   :  { %v1404_v15 = vpop.eup %1403  ;;  %1065 = vst.msk [vmem:[%s2269_s5 + $0x100] sm:$0xff] %vm567_vm2, %v1402_v13 }
 0x218   :  { %1405 = vtanh.f32 %v877_v14 }
 0x219   :  { %1407 = vtanh.f32 %v457_v12  ;;  %v489_v12 = vpop.f32.mrf.mxu3 }
 0x21a   :  { %1216 = vmatmul.msk.f32.gmra.mxu2 %vm567_vm2, %v1404_v15  ;;  %v490_v14 = vadd.f32 %v2068_v7, %v489_v12 }
 0x21d   :  { %v879_v17 = vpop.f32.mrf.mxu2 }
 0x21e   :  { %v1406_v19 = vpop.eup %1405  ;;  %v880_v20 = vadd.f32 %v1729_v30, %v879_v17 }
 0x21f   :  { %v1408_v22 = vpop.eup %1407  ;;  %1066 = vst.msk [vmem:[%s2269_s5 + $0x108] sm:$0xff] %vm567_vm2, %v1406_v19 }
 0x220   :  { %1409 = vtanh.f32 %v880_v20 }
 0x221   :  { %1411 = vtanh.f32 %v460_v18  ;;  %v492_v18 = vpop.f32.mrf.mxu3 }
 0x222   :  { %1217 = vmatmul.msk.f32.gmra.mxu2 %vm567_vm2, %v1408_v22  ;;  %v493_v20 = vadd.f32 %v2068_v7, %v492_v18 }
 0x225   :  { %v882_v24 = vpop.f32.mrf.mxu2 }
 0x226   :  { %v1410_v26 = vpop.eup %1409  ;;  %v883_v27 = vadd.f32 %v1729_v30, %v882_v24 }
 0x227   :  { %v1412_v28 = vpop.eup %1411  ;;  %1067 = vst.msk [vmem:[%s2269_s5 + $0x110] sm:$0xff] %vm567_vm2, %v1410_v26 }
 0x228   :  { %1413 = vtanh.f32 %v883_v27 }
 0x229   :  { %1415 = vtanh.f32 %v463_v25 }
 0x22a   :  { %1218 = vmatmul.msk.f32.gmra.mxu2 %vm567_vm2, %v1412_v28 }
 0x22d   :  { %v885_v31 = vpop.f32.mrf.mxu2 }
 0x22e   :  { %v1414_v33 = vpop.eup %1413  ;;  %v886_v34 = vadd.f32 %v1729_v30, %v885_v31 }
 0x22f   :  { %v1416_v35 = vpop.eup %1415  ;;  %1068 = vst.msk [vmem:[%s2269_s5 + $0x118] sm:$0xff] %vm567_vm2, %v1414_v33 }
 0x230   :  { %1417 = vtanh.f32 %v886_v34 }
 0x231   :  { %1419 = vtanh.f32 %v466_v32 }
 0x232   :  { %1219 = vmatmul.msk.f32.gmra.mxu2 %vm567_vm2, %v1416_v35 }
 0x235   :  { %v888_v36 = vpop.f32.mrf.mxu2 }
 0x236   :  { %v1418_v38 = vpop.eup %1417  ;;  %v889_v39 = vadd.f32 %v1729_v30, %v888_v36 }
 0x237   :  { %v1420_v41 = vpop.eup %1419  ;;  %1069 = vst.msk [vmem:[%s2269_s5 + $0x120] sm:$0xff] %vm567_vm2, %v1418_v38 }
 0x238   :  { %1421 = vtanh.f32 %v889_v39 }
 0x239   :  { %1423 = vtanh.f32 %v469_v37 }
 0x23a   :  { %1220 = vmatmul.msk.f32.gmra.mxu2 %vm567_vm2, %v1420_v41 }
 0x23d   :  { %v891_v42 = vpop.f32.mrf.mxu2 }
 0x23e   :  { %v1422_v44 = vpop.eup %1421  ;;  %v892_v45 = vadd.f32 %v1729_v30, %v891_v42 }
 0x23f   :  { %v1424_v46 = vpop.eup %1423  ;;  %1070 = vst.msk [vmem:[%s2269_s5 + $0x128] sm:$0xff] %vm567_vm2, %v1422_v44 }
 0x240   :  { %1425 = vtanh.f32 %v892_v45 }
 0x241   :  { %1427 = vtanh.f32 %v472_v43 }
 0x242   :  { %1221 = vmatmul.msk.f32.gmra.mxu2 %vm567_vm2, %v1424_v46 }
 0x245   :  { %v894_v48 = vpop.f32.mrf.mxu2 }
 0x246   :  { %v1426_v50 = vpop.eup %1425  ;;  %v895_v51 = vadd.f32 %v1729_v30, %v894_v48 }
 0x247   :  { %v1428_v52 = vpop.eup %1427  ;;  %1071 = vst.msk [vmem:[%s2269_s5 + $0x130] sm:$0xff] %vm567_vm2, %v1426_v50 }
 0x248   :  { %1429 = vtanh.f32 %v895_v51 }
 0x249   :  { %1431 = vtanh.f32 %v475_v49 }
 0x24a   :  { %1222 = vmatmul.msk.f32.gmra.mxu2 %vm567_vm2, %v1428_v52 }
 0x24d   :  { %v897_v54 = vpop.f32.mrf.mxu2 }
 0x24e   :  { %v1430_v56 = vpop.eup %1429  ;;  %v898_v57 = vadd.f32 %v1729_v30, %v897_v54 }
 0x24f   :  { %v1432_v58 = vpop.eup %1431  ;;  %1072 = vst.msk [vmem:[%s2269_s5 + $0x138] sm:$0xff] %vm567_vm2, %v1430_v56 }
 0x250   :  { %1433 = vtanh.f32 %v898_v57 }
 0x251   :  { %1435 = vtanh.f32 %v478_v55 }
 0x252   :  { %1223 = vmatmul.msk.f32.gmra.mxu2 %vm567_vm2, %v1432_v58 }
 0x255   :  { %v900_v60 = vpop.f32.mrf.mxu2 }
 0x256   :  { %v1434_v62 = vpop.eup %1433  ;;  %v901_v63 = vadd.f32 %v1729_v30, %v900_v60 }
 0x257   :  { %v1436_v0 = vpop.eup %1435  ;;  %1073 = vst.msk [vmem:[%s2269_s5 + $0x140] sm:$0xff] %vm567_vm2, %v1434_v62 }
 0x258   :  { %1437 = vtanh.f32 %v901_v63 }
 0x259   :  { %1439 = vtanh.f32 %v481_v61 }
 0x25a   :  { %1224 = vmatmul.msk.f32.gmra.mxu2 %vm567_vm2, %v1436_v0 }
 0x25d   :  { %v903_v1 = vpop.f32.mrf.mxu2 }
 0x25e   :  { %v1438_v3 = vpop.eup %1437  ;;  %v904_v4 = vadd.f32 %v1729_v30, %v903_v1 }
 0x25f   :  { %v1440_v6 = vpop.eup %1439  ;;  %1074 = vst.msk [vmem:[%s2269_s5 + $0x148] sm:$0xff] %vm567_vm2, %v1438_v3 }
 0x260   :  { %1441 = vtanh.f32 %v904_v4 }
 0x261   :  { %1443 = vtanh.f32 %v484_v2 }
 0x262   :  { %1225 = vmatmul.msk.f32.gmra.mxu2 %vm567_vm2, %v1440_v6 }
 0x265   :  { %v906_v8 = vpop.f32.mrf.mxu2 }
 0x266   :  { %v1442_v9 = vpop.eup %1441  ;;  %v907_v10 = vadd.f32 %v1729_v30, %v906_v8 }
 0x267   :  { %v1444_v11 = vpop.eup %1443  ;;  %1075 = vst.msk [vmem:[%s2269_s5 + $0x150] sm:$0xff] %vm567_vm2, %v1442_v9 }
 0x268   :  { %1445 = vtanh.f32 %v907_v10 }
 0x269   :  { %1447 = vtanh.f32 %v487_v21 }
 0x26a   :  { %1226 = vmatmul.msk.f32.gmra.mxu2 %vm567_vm2, %v1444_v11 }
 0x26d   :  { %v909_v13 = vpop.f32.mrf.mxu2 }
 0x26e   :  { %v1446_v15 = vpop.eup %1445  ;;  %v910_v16 = vadd.f32 %v1729_v30, %v909_v13 }
 0x26f   :  { %v1448_v17 = vpop.eup %1447  ;;  %1076 = vst.msk [vmem:[%s2269_s5 + $0x158] sm:$0xff] %vm567_vm2, %v1446_v15 }
 0x270   :  { %1449 = vtanh.f32 %v910_v16 }
 0x271   :  { %1451 = vtanh.f32 %v490_v14 }
 0x272   :  { %1227 = vmatmul.msk.f32.gmra.mxu2 %vm567_vm2, %v1448_v17 }
 0x275   :  { %v912_v19 = vpop.f32.mrf.mxu2 }
 0x276   :  { %v1450_v22 = vpop.eup %1449  ;;  %v913_v30 = vadd.f32 %v2161_v23, %v912_v19 }
 0x277   :  { %v1452_v24 = vpop.eup %1451  ;;  %1077 = vst.msk [vmem:[%s2269_s5 + $0x160] sm:$0xff] %vm567_vm2, %v1450_v22 }
 0x278   :  { %1453 = vtanh.f32 %v913_v30 }
 0x279   :  { %1455 = vtanh.f32 %v493_v20 }
 0x27a   :  { %1228 = vmatmul.msk.f32.gmra.mxu2 %vm567_vm2, %v1452_v24 }
 0x27d   :  { %v915_v25 = vpop.f32.mrf.mxu2 }
 0x27e   :  { %v1454_v7 = vpop.eup %1453  ;;  %v916_v26 = vadd.f32 %v2161_v23, %v915_v25 }
 0x27f   :  { %v1456_v27 = vpop.eup %1455  ;;  %1078 = vst.msk [vmem:[%s2269_s5 + $0x168] sm:$0xff] %vm567_vm2, %v1454_v7 }
 0x280   :  { %1457 = vtanh.f32 %v916_v26 }
 0x282   :  { %1229 = vmatmul.msk.f32.gmra.mxu2 %vm567_vm2, %v1456_v27 }
 0x285   :  { %v918_v28 = vpop.f32.mrf.mxu2 }
 0x286   :  { %v1458_v29 = vpop.eup %1457  ;;  %v919_v31 = vadd.f32 %v2161_v23, %v918_v28 }
 0x287   :  { %1079 = vst.msk [vmem:[%s2269_s5 + $0x170] sm:$0xff] %vm567_vm2, %v1458_v29 }
 0x288   :  { %1459 = vtanh.f32 %v919_v31 }
 0x28d   :  { %v921_v32 = vpop.f32.mrf.mxu2 }
 0x28e   :  { %v1460_v33 = vpop.eup %1459  ;;  %v922_v34 = vadd.f32 %v2161_v23, %v921_v32 }
 0x28f   :  { %1080 = vst.msk [vmem:[%s2269_s5 + $0x178] sm:$0xff] %vm567_vm2, %v1460_v33 }
 0x290   :  { %1461 = vtanh.f32 %v922_v34 }
 0x295   :  { %v924_v35 = vpop.f32.mrf.mxu2 }
 0x296   :  { %v1462_v36 = vpop.eup %1461  ;;  %v925_v37 = vadd.f32 %v2161_v23, %v924_v35 }
 0x297   :  { %1081 = vst.msk [vmem:[%s2269_s5 + $0x180] sm:$0xff] %vm567_vm2, %v1462_v36 }
 0x298   :  { %1463 = vtanh.f32 %v925_v37 }
 0x29d   :  { %v927_v38 = vpop.f32.mrf.mxu2 }
 0x29e   :  { %v1464_v39 = vpop.eup %1463  ;;  %v928_v40 = vadd.f32 %v2161_v23, %v927_v38 }
 0x29f   :  { %1082 = vst.msk [vmem:[%s2269_s5 + $0x188] sm:$0xff] %vm567_vm2, %v1464_v39 }
 0x2a0   :  { %1465 = vtanh.f32 %v928_v40 }
 0x2a5   :  { %v930_v41 = vpop.f32.mrf.mxu2 }
 0x2a6   :  { %v1466_v42 = vpop.eup %1465  ;;  %v931_v43 = vadd.f32 %v2161_v23, %v930_v41 }
 0x2a7   :  { %1083 = vst.msk [vmem:[%s2269_s5 + $0x190] sm:$0xff] %vm567_vm2, %v1466_v42 }
 0x2a8   :  { %1467 = vtanh.f32 %v931_v43 }
 0x2ad   :  { %v933_v44 = vpop.f32.mrf.mxu2 }
 0x2ae   :  { %v1468_v45 = vpop.eup %1467  ;;  %v934_v46 = vadd.f32 %v2161_v23, %v933_v44 }
 0x2af   :  { %1084 = vst.msk [vmem:[%s2269_s5 + $0x198] sm:$0xff] %vm567_vm2, %v1468_v45 }
 0x2b0   :  { %1469 = vtanh.f32 %v934_v46 }
 0x2b5   :  { %v936_v47 = vpop.f32.mrf.mxu2 }
 0x2b6   :  { %v1470_v48 = vpop.eup %1469  ;;  %v937_v49 = vadd.f32 %v2161_v23, %v936_v47 }
 0x2b7   :  { %1085 = vst.msk [vmem:[%s2269_s5 + $0x1a0] sm:$0xff] %vm567_vm2, %v1470_v48 }
 0x2b8   :  { %1471 = vtanh.f32 %v937_v49 }
 0x2bd   :  { %v939_v50 = vpop.f32.mrf.mxu2 }
 0x2be   :  { %v1472_v51 = vpop.eup %1471  ;;  %v940_v52 = vadd.f32 %v2161_v23, %v939_v50 }
 0x2bf   :  { %1086 = vst.msk [vmem:[%s2269_s5 + $0x1a8] sm:$0xff] %vm567_vm2, %v1472_v51 }
 0x2c0   :  { %1473 = vtanh.f32 %v940_v52 }
 0x2c5   :  { %v942_v53 = vpop.f32.mrf.mxu2 }
 0x2c6   :  { %v1474_v54 = vpop.eup %1473  ;;  %v943_v55 = vadd.f32 %v2161_v23, %v942_v53 }
 0x2c7   :  { %1087 = vst.msk [vmem:[%s2269_s5 + $0x1b0] sm:$0xff] %vm567_vm2, %v1474_v54 }
 0x2c8   :  { %1475 = vtanh.f32 %v943_v55 }
 0x2cd   :  { %v945_v56 = vpop.f32.mrf.mxu2 }
 0x2ce   :  { %v1476_v57 = vpop.eup %1475  ;;  %v946_v58 = vadd.f32 %v2161_v23, %v945_v56 }
 0x2cf   :  { %1088 = vst.msk [vmem:[%s2269_s5 + $0x1b8] sm:$0xff] %vm567_vm2, %v1476_v57 }
 0x2d0   :  { %1477 = vtanh.f32 %v946_v58 }
 0x2d5   :  { %v948_v59 = vpop.f32.mrf.mxu2 }
 0x2d6   :  { %v1478_v60 = vpop.eup %1477  ;;  %v949_v61 = vadd.f32 %v2161_v23, %v948_v59 }
 0x2d7   :  { %1089 = vst.msk [vmem:[%s2269_s5 + $0x1c0] sm:$0xff] %vm567_vm2, %v1478_v60 }
 0x2d8   :  { %1479 = vtanh.f32 %v949_v61 }
 0x2dd   :  { %v951_v62 = vpop.f32.mrf.mxu2 }
 0x2de   :  { %v1480_v63 = vpop.eup %1479  ;;  %v952_v0 = vadd.f32 %v2161_v23, %v951_v62 }
 0x2df   :  { %1090 = vst.msk [vmem:[%s2269_s5 + $0x1c8] sm:$0xff] %vm567_vm2, %v1480_v63 }
 0x2e0   :  { %1481 = vtanh.f32 %v952_v0 }
 0x2e5   :  { %v954_v1 = vpop.f32.mrf.mxu2 }
 0x2e6   :  { %v1482_v2 = vpop.eup %1481  ;;  %v955_v3 = vadd.f32 %v2161_v23, %v954_v1 }
 0x2e7   :  { %1091 = vst.msk [vmem:[%s2269_s5 + $0x1d0] sm:$0xff] %vm567_vm2, %v1482_v2 }
 0x2e8   :  { %1483 = vtanh.f32 %v955_v3 }
 0x2ed   :  { %v957_v4 = vpop.f32.mrf.mxu2 }
 0x2ee   :  { %v1484_v5 = vpop.eup %1483  ;;  %v958_v6 = vadd.f32 %v2161_v23, %v957_v4 }
 0x2ef   :  { %1092 = vst.msk [vmem:[%s2269_s5 + $0x1d8] sm:$0xff] %vm567_vm2, %v1484_v5 }
 0x2f0   :  { %1485 = vtanh.f32 %v958_v6 }
 0x2f5   :  { %v960_v8 = vpop.f32.mrf.mxu2 }
 0x2f6   :  { %v1486_v21 = vpop.eup %1485  ;;  %v961_v9 = vadd.f32 %v2161_v23, %v960_v8 }
 0x2f7   :  { %1093 = vst.msk [vmem:[%s2269_s5 + $0x1e0] sm:$0xff] %vm567_vm2, %v1486_v21 }
 0x2f8   :  { %1487 = vtanh.f32 %v961_v9 }
 0x2fd   :  { %v963_v10 = vpop.f32.mrf.mxu2 }
 0x2fe   :  { %v1488_v11 = vpop.eup %1487  ;;  %v964_v12 = vadd.f32 %v2161_v23, %v963_v10 }
 0x2ff   :  { %1094 = vst.msk [vmem:[%s2269_s5 + $0x1e8] sm:$0xff] %vm567_vm2, %v1488_v11 }
 0x300   :  { %1489 = vtanh.f32 %v964_v12 }
 0x305   :  { %v966_v13 = vpop.f32.mrf.mxu2 }
 0x306   :  { %v1490_v14 = vpop.eup %1489  ;;  %v967_v15 = vadd.f32 %v2161_v23, %v966_v13 }
 0x307   :  { %1095 = vst.msk [vmem:[%s2269_s5 + $0x1f0] sm:$0xff] %vm567_vm2, %v1490_v14 }
 0x308   :  { %1491 = vtanh.f32 %v967_v15 }
 0x30e   :  { %v1492_v16 = vpop.eup %1491 }
 0x30f   :  { %1096 = vst.msk [vmem:[%s2269_s5 + $0x1f8] sm:$0xff] %vm567_vm2, %v1492_v16 }

</bundles_post_ra>
